<compile_context>
chip_gen: v7x
topology: tpu7x:2x2x1
jax: 0.10.0
libtpu: 0.0.40
codegen_flags: <defaults>
</compile_context>

<pallas_src>
import jax
import jax.numpy as jnp
from jax.experimental import pallas as pl
from jax.experimental.pallas import tpu as pltpu

HIDDEN = 128


def _round_up(x, m):
    return ((x + m - 1) // m) * m


def _pick_tiling(B, *, single_tile_max=1024, block_b=2048):
    """Choose (tile_rows, padded_batch, n_steps).

    Small/medium batches: one tile of round_up(B, 8) rows (no pad beyond sublane
    rounding, single grid step).  Large batches: >=2 tiles of <= block_b rows so
    the parallel batch axis can use both TensorCores on v7x; padding waste is at
    most n_steps * 8 rows.
    """
    B8 = _round_up(B, 8)
    if B8 <= single_tile_max:
        return B8, B8, 1
    n = max(2, pl.cdiv(B8, block_b))
    TB = _round_up(pl.cdiv(B8, n), 8)
    return TB, n * TB, n


def policy_kernel(x_ref, w1_ref, b1_ref, w2_ref, b2_ref, out_ref):
    # x: (TB, D), w1: (D, 128), b1: (1, 128), w2: (128, A), b2: (1, A)
    x = x_ref[...]

    # affine1: x @ W1 + b1   (MXU matmul, f32 accumulation)
    h = jnp.dot(x, w1_ref[...], preferred_element_type=jnp.float32) + b1_ref[...]

    # dropout (eval mode: identity), then ReLU (VPU elementwise)
    h = jnp.maximum(h, 0.0)

    # affine2: h @ W2 + b2
    scores = jnp.dot(h, w2_ref[...], preferred_element_type=jnp.float32) + b2_ref[...]

    # numerically stable softmax over the action axis (exact division; the
    # epilogue is nowhere near the bottleneck).
    m = jnp.max(scores, axis=-1, keepdims=True)
    e = jnp.exp(scores - m)
    denom = jnp.sum(e, axis=-1, keepdims=True)
    out_ref[...] = (e / denom).astype(out_ref.dtype)


def policy_forward(x, w1, b1, w2, b2):
    """Batched policy forward.  x: (B, D) f32.  Returns (B, A) action probs."""
    B, D = x.shape
    A = w2.shape[1]

    TB, B_pad, n_steps = _pick_tiling(B)
    if B_pad != B:
        x = jnp.pad(x, ((0, B_pad - B), (0, 0)))

    out = pl.pallas_call(
        policy_kernel,
        out_shape=jax.ShapeDtypeStruct((B_pad, A), jnp.float32),
        grid_spec=pltpu.PrefetchScalarGridSpec(
            num_scalar_prefetch=0,
            grid=(n_steps,),
            in_specs=[
                # x: streamed per batch tile (double-buffered by the pipeline).
                pl.BlockSpec((TB, D), lambda i: (i, 0)),
                # weights / biases: resident across all grid steps.
                pl.BlockSpec((D, HIDDEN), lambda i: (0, 0)),
                pl.BlockSpec((1, HIDDEN), lambda i: (0, 0)),
                pl.BlockSpec((HIDDEN, A), lambda i: (0, 0)),
                pl.BlockSpec((1, A), lambda i: (0, 0)),
            ],
            # Narrow (TB, A) output: last dim equals the full array dim, so the
            # block is legal; masked stores are cheap here and HBM bytes drop ~32x
            # versus padding A to 128 lanes.
            out_specs=pl.BlockSpec((TB, A), lambda i: (i, 0)),
        ),
        compiler_params=pltpu.CompilerParams(
            # Independent batch tiles: shard across TCs on v7x megacore.
            dimension_semantics=("parallel",),
            # Conservative scoped-VMEM budget; working set is far below it.
            vmem_limit_bytes=32 * 1024 * 1024,
        ),
    )(x, w1, b1, w2, b2)

    # Strip batch padding only when it was added (common case: no slice at all).
    if B_pad != B:
        out = out[:B]
    return out


def init_params(key, obs_dim, action_dim):
    """Deterministic init mimicking nn.Linear's uniform(-1/sqrt(fan_in), +1/sqrt(fan_in)).

    Weights are stored pre-transposed as (in_features, out_features); biases as
    (1, out_features) — a one-time prep, so no per-call layout work remains.
    """
    k1, k2, k3, k4 = jax.random.split(key, 4)
    bound1 = 1.0 / jnp.sqrt(obs_dim)
    bound2 = 1.0 / jnp.sqrt(HIDDEN)
    w1 = jax.random.uniform(k1, (obs_dim, HIDDEN), jnp.float32, -bound1, bound1)
    b1 = jax.random.uniform(k2, (1, HIDDEN), jnp.float32, -bound1, bound1)
    w2 = jax.random.uniform(k3, (HIDDEN, action_dim), jnp.float32, -bound2, bound2)
    b2 = jax.random.uniform(k4, (1, action_dim), jnp.float32, -bound2, bound2)
    return w1, b1, w2, b2


def reference_forward(x, w1, b1, w2, b2):
    h = jnp.maximum(x @ w1 + b1, 0.0)
    s = h @ w2 + b2
    return jax.nn.softmax(s, axis=1)


if __name__ == "__main__":
    key = jax.random.PRNGKey(0)
    k_x, k_p = jax.random.split(key)

    batch, obs_dim, action_dim = 8, 16, 4  # 1-d observation space of size 16
    x = jax.random.normal(k_x, (batch, obs_dim), jnp.float32)
    w1, b1, w2, b2 = init_params(k_p, obs_dim, action_dim)

    out = policy_forward(x, w1, b1, w2, b2)
    out = jax.block_until_ready(out)

    ref = reference_forward(x, w1, b1, w2, b2)
    assert out.shape == (batch, action_dim)
    assert jnp.allclose(out, ref, atol=1e-5, rtol=1e-5)
    # rows of a softmax must sum to 1
    assert jnp.allclose(jnp.sum(out, axis=1), jnp.ones((batch,)), atol=1e-5)

    # medium batch: single-tile path, no batch pad, no output slice
    xb = jax.random.normal(k_x, (1000, obs_dim), jnp.float32)
    out_b = jax.block_until_ready(policy_forward(xb, w1, b1, w2, b2))
    ref_b = reference_forward(xb, w1, b1, w2, b2)
    assert out_b.shape == (1000, action_dim)
    assert jnp.allclose(out_b, ref_b, atol=1e-5, rtol=1e-5)

    # large, non-multiple batch: multi-tile ("parallel") path with small pad
    xc = jax.random.normal(k_x, (2500, obs_dim), jnp.float32)
    out_c = jax.block_until_ready(policy_forward(xc, w1, b1, w2, b2))
    ref_c = reference_forward(xc, w1, b1, w2, b2)
    assert out_c.shape == (2500, action_dim)
    assert jnp.allclose(out_c, ref_c, atol=1e-5, rtol=1e-5)

    print("KERNEL_OK")
</pallas_src>

<mosaic_0001>
module attributes {stable_mosaic.version = 11 : i64} {
  func.func @policy_kernel(%arg0: i32, %arg1: memref<8x16xf32, #tpu.memory_space<vmem>>, %arg2: memref<16x128xf32, #tpu.memory_space<vmem>>, %arg3: memref<1x128xf32, #tpu.memory_space<vmem>>, %arg4: memref<128x4xf32, #tpu.memory_space<vmem>>, %arg5: memref<1x4xf32, #tpu.memory_space<vmem>>, %arg6: memref<8x4xf32, #tpu.memory_space<vmem>>) attributes {dimension_semantics = [#tpu.dimension_semantics<parallel>], iteration_bounds = array<i64: 1>, scalar_prefetch = 0 : i64, scratch_operands = 0 : i64, tpu.core_type = #tpu.core_type<tc>, window_params = [{transform_indices = @transform_0, window_bounds = array<i64: 8, 16>}, {pipeline_mode = #tpu.pipeline_mode<synchronous>, transform_indices = @transform_1, window_bounds = array<i64: 16, 128>}, {pipeline_mode = #tpu.pipeline_mode<synchronous>, transform_indices = @transform_2, window_bounds = array<i64: 1, 128>}, {pipeline_mode = #tpu.pipeline_mode<synchronous>, transform_indices = @transform_3, window_bounds = array<i64: 128, 4>}, {pipeline_mode = #tpu.pipeline_mode<synchronous>, transform_indices = @transform_4, window_bounds = array<i64: 1, 4>}, {transform_indices = @transform_5, window_bounds = array<i64: 8, 4>}]} {
    %c0 = arith.constant 0 : index
    %c0_0 = arith.constant 0 : index
    %0 = vector.load %arg1[%c0, %c0_0] : memref<8x16xf32, #tpu.memory_space<vmem>>, vector<8x16xf32>
    %c0_1 = arith.constant 0 : index
    %c0_2 = arith.constant 0 : index
    %1 = vector.load %arg2[%c0_1, %c0_2] : memref<16x128xf32, #tpu.memory_space<vmem>>, vector<16x128xf32>
    %cst = arith.constant dense<0.000000e+00> : vector<8x128xf32>
    %2 = tpu.matmul %0, %1, %cst {dimension_numbers = #tpu.dot_dimension_numbers<[1], [0], [0], [1], [0, 0, 1, 1], [], []>} : vector<8x16xf32>, vector<16x128xf32>, vector<8x128xf32> -> vector<8x128xf32>
    %c0_3 = arith.constant 0 : index
    %c0_4 = arith.constant 0 : index
    %3 = vector.load %arg3[%c0_3, %c0_4] : memref<1x128xf32, #tpu.memory_space<vmem>>, vector<1x128xf32>
    %4 = vector.broadcast %3 : vector<1x128xf32> to vector<8x128xf32>
    %5 = arith.addf %2, %4 : vector<8x128xf32>
    %cst_5 = arith.constant 0.000000e+00 : f32
    %6 = vector.broadcast %cst_5 : f32 to vector<8x128xf32>
    %7 = arith.maximumf %5, %6 : vector<8x128xf32>
    %c0_6 = arith.constant 0 : index
    %c0_7 = arith.constant 0 : index
    %8 = vector.load %arg4[%c0_6, %c0_7] : memref<128x4xf32, #tpu.memory_space<vmem>>, vector<128x4xf32>
    %cst_8 = arith.constant dense<0.000000e+00> : vector<8x4xf32>
    %9 = tpu.matmul %7, %8, %cst_8 {dimension_numbers = #tpu.dot_dimension_numbers<[1], [0], [0], [1], [0, 0, 1, 1], [], []>} : vector<8x128xf32>, vector<128x4xf32>, vector<8x4xf32> -> vector<8x4xf32>
    %c0_9 = arith.constant 0 : index
    %c0_10 = arith.constant 0 : index
    %10 = vector.load %arg5[%c0_9, %c0_10] : memref<1x4xf32, #tpu.memory_space<vmem>>, vector<1x4xf32>
    %11 = vector.broadcast %10 : vector<1x4xf32> to vector<8x4xf32>
    %12 = arith.addf %9, %11 : vector<8x4xf32>
    %cst_11 = arith.constant dense<0xFF800000> : vector<8xf32>
    %13 = vector.multi_reduction <maximumf>, %12, %cst_11 [1] : vector<8x4xf32> to vector<8xf32>
    %14 = vector.shape_cast %13 : vector<8xf32> to vector<8x1xf32>
    %15 = vector.broadcast %14 : vector<8x1xf32> to vector<8x4xf32>
    %16 = arith.subf %12, %15 : vector<8x4xf32>
    %17 = math.exp %16 : vector<8x4xf32>
    %cst_12 = arith.constant dense<0.000000e+00> : vector<8xf32>
    %18 = vector.multi_reduction <add>, %17, %cst_12 [1] : vector<8x4xf32> to vector<8xf32>
    %19 = vector.shape_cast %18 : vector<8xf32> to vector<8x1xf32>
    %20 = vector.broadcast %19 : vector<8x1xf32> to vector<8x4xf32>
    %21 = arith.divf %17, %20 : vector<8x4xf32>
    %c0_13 = arith.constant 0 : index
    %c0_14 = arith.constant 0 : index
    %22 = vector.load %arg6[%c0_13, %c0_14] : memref<8x4xf32, #tpu.memory_space<vmem>>, vector<8x4xf32>
    tpu.vector_store %arg6[%c0_13, %c0_14], %21 {strides = array<i32>} : memref<8x4xf32, #tpu.memory_space<vmem>>, vector<8x4xf32>,
    return
  }
  func.func @transform_0(%arg0: i32) -> (i32, i32) {
    %c0_i32 = arith.constant 0 : i32
    %c0_i32_0 = arith.constant 0 : i32
    return %arg0, %c0_i32 : i32, i32
  }
  func.func @transform_1(%arg0: i32) -> (i32, i32) {
    %c0_i32 = arith.constant 0 : i32
    %c0_i32_0 = arith.constant 0 : i32
    %c0_i32_1 = arith.constant 0 : i32
    return %c0_i32, %c0_i32_0 : i32, i32
  }
  func.func @transform_2(%arg0: i32) -> (i32, i32) {
    %c0_i32 = arith.constant 0 : i32
    %c0_i32_0 = arith.constant 0 : i32
    %c0_i32_1 = arith.constant 0 : i32
    return %c0_i32, %c0_i32_0 : i32, i32
  }
  func.func @transform_3(%arg0: i32) -> (i32, i32) {
    %c0_i32 = arith.constant 0 : i32
    %c0_i32_0 = arith.constant 0 : i32
    %c0_i32_1 = arith.constant 0 : i32
    return %c0_i32, %c0_i32_0 : i32, i32
  }
  func.func @transform_4(%arg0: i32) -> (i32, i32) {
    %c0_i32 = arith.constant 0 : i32
    %c0_i32_0 = arith.constant 0 : i32
    %c0_i32_1 = arith.constant 0 : i32
    return %c0_i32, %c0_i32_0 : i32, i32
  }
  func.func @transform_5(%arg0: i32) -> (i32, i32) {
    %c0_i32 = arith.constant 0 : i32
    %c0_i32_0 = arith.constant 0 : i32
    return %arg0, %c0_i32 : i32, i32
  }
}

</mosaic_0001>

<bundles_post_ra>
// kernel: tpu_custom_call.1
= control target key start
LH: loop header
LB: loop body
LE: loop exit
PB: predicated region body
PF: predicated region fallthrough
CT: control target
= control target key end

     0   :  { %v314_v0 = vmov 0.0|0.0   ;;  %vm315_vm0 = vmmov 0   ;;  %v316_v3 = vmov 0.0   ;;  %vm30_vm1 = vcmask 130048   ;;  %s416_s1 = inlined_call_operand.vmem [shape: f32[16,128], index: 1, kind: input, shape index: {}]   ;;  %s417_s3 = inlined_call_operand.vmem [shape: f32[128,4], index: 3, kind: input, shape index: {}]   ;;  %s418_s0 = inlined_call_operand.vmem [shape: f32[8,16], index: 0, kind: input, shape index: {}]   ;;  %s419_s2 = inlined_call_operand.vmem [shape: f32[1,128], index: 2, kind: input, shape index: {}]   ;;  %s420_s4 = inlined_call_operand.vmem [shape: f32[1,4], index: 4, kind: input, shape index: {}]   ;;  %s421_s5 = inlined_call_operand.vmem [shape: f32[8,4], index: 5, kind: output, shape index: {}]  }
   0x1   :  { %280 = vmatprep.subr.bf16.mxu0 %v314_v0  ;;  %v21_v1 = vld [vmem:[%s416_s1] sm:$0xff]  ;;  %v22_v2 = vld [vmem:[%s416_s1 + $0x8] sm:$0xff]  ;;  %242 = vmatprep.mubr.msk.f32.mxu0 %vm315_vm0, %v316_v3  ;;  %v107_v7 = vld [vmem:[%s417_s3 + $0x10] sm:$0xff]  ;;  %vm198_vm2 = vcmask 31744  }
   0x2   :  { %v281_v4 = vpack.c.bf16 %v22_v2, %v21_v1  ;;  %283 = vmatprep.subr.bf16.mxu1 %v314_v0  ;;  %v105_v5 = vld [vmem:[%s417_s3] sm:$0xff]  ;;  %v106_v6 = vld [vmem:[%s417_s3 + $0x8] sm:$0xff]  ;;  %277 = vmatprep.mubr.msk.f32.mxu1 %vm315_vm0, %v316_v3  ;;  %v108_v9 = vld [vmem:[%s417_s3 + $0x18] sm:$0xff] }
   0x3   :  { %v284_v8 = vpack.c.bf16 %v106_v6, %v105_v5  ;;  %v20_v10 = vld [vmem:[%s418_s0] sm:$0xff]  ;;  %v287_v11 = vpack.c.bf16 %v108_v9, %v107_v7  ;;  %v110_v13 = vld [vmem:[%s417_s3 + $0x28] sm:$0xff]  ;;  %v111_v15 = vld [vmem:[%s417_s3 + $0x30] sm:$0xff] }
   0x4   :  { %282 = vmatpush3.bf16.msra.mxu0 %v281_v4  ;;  %v109_v12 = vld [vmem:[%s417_s3 + $0x20] sm:$0xff]  ;;  %v112_v16 = vld [vmem:[%s417_s3 + $0x38] sm:$0xff]  ;;  %v114_v19 = vld [vmem:[%s417_s3 + $0x48] sm:$0xff] }
   0x5   :  { %285 = vmatpush3.bf16.msra.mxu1 %v284_v8  ;;  %v290_v14 = vpack.c.bf16 %v110_v13, %v109_v12  ;;  %v293_v17 = vpack.c.bf16 %v112_v16, %v111_v15  ;;  %v113_v18 = vld [vmem:[%s417_s3 + $0x40] sm:$0xff]  ;;  %v115_v21 = vld [vmem:[%s417_s3 + $0x50] sm:$0xff]  ;;  %v116_v22 = vld [vmem:[%s417_s3 + $0x58] sm:$0xff] }
   0x6   :  { %286 = vmatprep.subr.bf16.mxu1 %v314_v0  ;;  %v296_v20 = vpack.c.bf16 %v114_v19, %v113_v18  ;;  %v299_v23 = vpack.c.bf16 %v116_v22, %v115_v21  ;;  %v117_v24 = vld [vmem:[%s417_s3 + $0x60] sm:$0xff]  ;;  %v118_v25 = vld [vmem:[%s417_s3 + $0x68] sm:$0xff]  ;;  %v119_v27 = vld [vmem:[%s417_s3 + $0x70] sm:$0xff] }
   0x7   :  { %243 = vmatmul.mubr.msk.f32.vlgmr.msra.gmra.mrb[0].mxu0 %vm30_vm1, %v20_v10  ;;  %v302_v26 = vpack.c.bf16 %v118_v25, %v117_v24  ;;  %v120_v28 = vld [vmem:[%s417_s3 + $0x78] sm:$0xff]  ;;  %v215_v30 = vld [vmem:[%s419_s2] ss:$0 sm:$0xff] }
   0x8   :  { %v305_v29 = vpack.c.bf16 %v120_v28, %v119_v27  ;;  %v217_v35 = vld [vmem:[%s420_s4] ss:$0 sm:$0xff] }
   0x9   :  { %288 = vmatpush3.bf16.msra.mxu1 %v287_v11 }
   0xa   :  { %289 = vmatprep.subr.bf16.mxu1 %v314_v0 }
   0xd   :  { %291 = vmatpush3.bf16.msra.mxu1 %v290_v14 }
   0xe   :  { %292 = vmatprep.subr.bf16.mxu1 %v314_v0 }
  0x11   :  { %294 = vmatpush3.bf16.msra.mxu1 %v293_v17 }
  0x12   :  { %295 = vmatprep.subr.bf16.mxu1 %v314_v0 }
  0x15   :  { %297 = vmatpush3.bf16.msra.mxu1 %v296_v20 }
  0x16   :  { %298 = vmatprep.subr.bf16.mxu1 %v314_v0 }
  0x19   :  { %300 = vmatpush3.bf16.msra.mxu1 %v299_v23 }
  0x1a   :  { %301 = vmatprep.subr.bf16.mxu1 %v314_v0 }
  0x1d   :  { %303 = vmatpush3.bf16.msra.mxu1 %v302_v26 }
  0x1e   :  { %304 = vmatprep.subr.bf16.mxu1 %v314_v0 }
  0x21   :  { %306 = vmatpush3.bf16.msra.mxu1 %v305_v29 }
  0xda   :  { %v100_v31 = vpop.f32.mrb[0].mxu0 }
  0xdb   :  { %v101_v32 = vadd.f32 %v215_v30, %v100_v31  ;;  %v244_v33 = vpop.f32.mrb[1].mxu0 }
  0xdd   :  { %v104_v34 = vmax.f32 %v101_v32, 0.0 }
  0xdf   :  { %278 = vmatmul.mubr.f32.vlgmr.msra.gmra.mrb[0].mxu1 %v104_v34 }
 0x1b2   :  { %v194_v36 = vpop.f32.mrb[0].mxu1 }
 0x1b3   :  { %v195_v37 = vadd.f32 %v217_v35, %v194_v36  ;;  %v279_v38 = vpop.f32.mrb[1].mxu1 }
 0x1b5   :  { %v199_v39 = vsel %vm198_vm2, %v195_v37, -inf }
 0x1b6   :  { %200 = vmax.xlane.f32.xlu0 %v199_v39 }
 0x243   :  { %v201_v40 = vpop.xlane.xlu0 %200 }
 0x244   :  { %v202_v41 = vsub.f32 %v195_v37, %v201_v40 }
 0x246   :  { %v203_v42 = vmul.f32 1.442695, %v202_v41 }
 0x248   :  { %310 = vpow2.f32 %v203_v42 }
 0x252   :  { %v311_v43 = vpop.eup %310 }
 0x253   :  { %v205_v44 = vsel %vm198_vm2, %v311_v43, 0.0 }
 0x254   :  { %206 = vadd.xlane.f32.xlu0 %v205_v44 }
 0x2e1   :  { %v207_v45 = vpop.xlane.xlu0 %206 }
 0x2e2   :  { %312 = vrcp.f32 %v207_v45 }
 0x2ec   :  { %v313_v46 = vpop.eup %312 }
 0x2ed   :  { %v209_v47 = vmul.f32 %v313_v46, %v311_v43 }
 0x2ef   :  { %210 = vst.msk [vmem:[%s421_s5] sm:$0xff] %vm198_vm2, %v209_v47 }

</bundles_post_ra>
